<compile_context>
chip_gen: v7x
topology: tpu7x:2x2x1
jax: 0.10.0
libtpu: 0.0.40
codegen_flags: <defaults>
</compile_context>

<pallas_src>
import functools

import jax
import jax.numpy as jnp
from jax.experimental import pallas as pl
from jax.experimental.pallas import tpu as pltpu


def _rmsnorm_kernel(x_ref, w_ref, o_ref, *, eps, inv_dim):
    # x_ref: (block_rows, dim), w_ref: (1, dim), o_ref: (block_rows, dim)
    x = x_ref[...].astype(jnp.float32)
    w = w_ref[...].astype(jnp.float32)           # broadcasts over rows
    # sum + compile-time 1/dim scale -> one XLU lane-reduce + one VPU scalar mul.
    ss = jnp.sum(x * x, axis=-1, keepdims=True)  # (block_rows, 1)
    inv_rms = jax.lax.rsqrt(ss * inv_dim + eps)  # rsqrt lands on the EUP slot
    o_ref[...] = (w * (x * inv_rms)).astype(o_ref.dtype)


def _vmem_budgets():
    """Generation-aware (buffer_budget_bytes, vmem_limit_bytes)."""
    cap = None
    try:
        info = pltpu.get_tpu_info()
        cap = getattr(info, "vmem_capacity_bytes", None)
    except Exception:
        cap = None
    if cap is None:
        cap = 128 * 1024 * 1024  # conservative fallback: assume v5e/v6e-class
    if cap <= 64 * 1024 * 1024:
        # v7x-class: 64 MiB physical per TC, 3.2 TB/s HBM -> push tiles larger
        # so the ~0.35 us/step overhead shrinks relative to DMA time.
        return 36 * 1024 * 1024, 52 * 1024 * 1024
    # v5e/v6e: 128 MiB physical VMEM; raise scoped limit above the 16/32 MiB
    # default, keep ~24 MiB of pipelined tile buffers (already >6 us/step).
    return 24 * 1024 * 1024, 48 * 1024 * 1024


def _pick_block_rows(rows, dim, itemsize, vmem_buffer_budget_bytes):
    # Sub-32-bit dtypes pack along sublanes: 8 rows f32, 16 bf16, 32 int8/fp8.
    sublane = max(8, 32 // max(itemsize, 1))
    # Per-row VMEM cost: double-buffered in + out tiles at the input dtype,
    # plus ~4 f32-wide temporaries materialized inside the kernel body
    # (f32 upcast, x*x, scaled product, cast staging) — conservative so
    # bf16/int8 inputs stay inside the scoped VMEM limit.
    per_row_bytes = dim * (4 * itemsize + 4 * 4)
    br = vmem_buffer_budget_bytes // max(per_row_bytes, 1)
    # No artificial row cap: sized purely by bytes so small-dim shapes still
    # get multi-MiB tiles (amortizing per-grid-step overhead).
    rows_rounded = ((rows + sublane - 1) // sublane) * sublane
    br = min(br, rows_rounded)
    br = (br // sublane) * sublane
    return max(br, sublane)


def rmsnorm(x, weight, eps=1e-6, block_rows=None):
    """RMSNorm over the last axis. x: (..., dim), weight: (dim,). Same shape/dtype as x."""
    orig_shape = x.shape
    dim = orig_shape[-1]
    x2 = x.reshape(-1, dim)
    rows = x2.shape[0]
    itemsize = jnp.dtype(x.dtype).itemsize

    buffer_budget, vmem_limit = _vmem_budgets()
    if block_rows is None:
        block_rows = _pick_block_rows(rows, dim, itemsize, buffer_budget)

    w2 = weight.reshape(1, dim)
    grid = (pl.cdiv(rows, block_rows),)  # ragged last block handled by Pallas

    kernel = functools.partial(_rmsnorm_kernel, eps=float(eps), inv_dim=1.0 / dim)

    cost = pl.CostEstimate(
        flops=4 * rows * dim,
        transcendentals=rows,
        bytes_accessed=2 * rows * dim * itemsize
        + dim * jnp.dtype(weight.dtype).itemsize,
    )

    # NOTE: for deployments with dim < 128 (like the small test below), the lane
    # axis is under-utilized; typical model dims (multiples of 128) are lane-dense.
    out = pl.pallas_call(
        kernel,
        out_shape=jax.ShapeDtypeStruct((rows, dim), x.dtype),
        grid_spec=pltpu.PrefetchScalarGridSpec(
            num_scalar_prefetch=0,
            grid=grid,
            in_specs=[
                pl.BlockSpec((block_rows, dim), lambda i: (i, 0)),
                # Constant block index -> Pallas fetches the weight tile once
                # and skips the DMA on subsequent grid steps.
                pl.BlockSpec((1, dim), lambda i: (0, 0)),
            ],
            out_specs=pl.BlockSpec((block_rows, dim), lambda i: (i, 0)),
        ),
        compiler_params=pltpu.CompilerParams(
            # Row loop is embarrassingly parallel; shard across TCs where the
            # compiler supports it, harmless/neutral on single-TC chips.
            dimension_semantics=("parallel",),
            vmem_limit_bytes=vmem_limit,
        ),
        cost_estimate=cost,
    )(x2, w2)

    return out.reshape(orig_shape)


def _ref_rmsnorm(x, weight, eps=1e-6):
    rms = jnp.sqrt(jnp.mean(x.astype(jnp.float32) ** 2, axis=-1, keepdims=True) + eps)
    return (weight * (x / rms)).astype(x.dtype)


if __name__ == "__main__":
    key = jax.random.PRNGKey(0)
    k1, k2, k3 = jax.random.split(key, 3)

    # Small shape consistent with the module: (batch, seq, dim).
    batch, seq, dim = 2, 8, 32
    x = jax.random.normal(k1, (batch, seq, dim), dtype=jnp.float32)
    weight = jnp.ones((dim,), dtype=jnp.float32)  # matches nn.Parameter(torch.ones(dim))

    y = rmsnorm(x, weight, eps=1e-6)
    jax.block_until_ready(y)
    y_ref = _ref_rmsnorm(x, weight, eps=1e-6)
    assert y.shape == x.shape and y.dtype == x.dtype
    assert jnp.allclose(y, y_ref, atol=1e-5, rtol=1e-5)

    # Ragged row count (rows = 15, not a multiple of 8) + non-trivial weight:
    # exercises the cdiv grid / clipped last block with no host-side pad/slice.
    x2 = jax.random.normal(k2, (3, 5, 128), dtype=jnp.float32)
    w2 = 0.5 + jax.random.uniform(k3, (128,), dtype=jnp.float32)
    y2 = rmsnorm(x2, w2, eps=1e-6, block_rows=8)  # forces a partial last block
    jax.block_until_ready(y2)
    y2_ref = _ref_rmsnorm(x2, w2, eps=1e-6)
    assert y2.shape == x2.shape and y2.dtype == x2.dtype
    assert jnp.allclose(y2, y2_ref, atol=1e-5, rtol=1e-5)

    # Auto-sized block_rows path on a lane-dense dim (no explicit block_rows):
    # with the row cap removed this picks the byte-budgeted tile, clipped to
    # the (rounded) problem size.
    x3 = jax.random.normal(k1, (4, 16, 256), dtype=jnp.bfloat16)
    w3 = jnp.ones((256,), dtype=jnp.bfloat16)
    y3 = rmsnorm(x3, w3, eps=1e-6)
    jax.block_until_ready(y3)
    y3_ref = _ref_rmsnorm(x3, w3, eps=1e-6)
    assert y3.shape == x3.shape and y3.dtype == x3.dtype
    assert jnp.allclose(y3.astype(jnp.float32), y3_ref.astype(jnp.float32),
                        atol=2e-2, rtol=2e-2)

    print("KERNEL_OK")
</pallas_src>

<mosaic_0001>
module attributes {stable_mosaic.version = 11 : i64} {
  func.func @_rmsnorm_kernel(%arg0: i32, %arg1: memref<16x32xf32, #tpu.memory_space<vmem>>, %arg2: memref<1x32xf32, #tpu.memory_space<vmem>>, %arg3: memref<16x32xf32, #tpu.memory_space<vmem>>) attributes {dimension_semantics = [#tpu.dimension_semantics<parallel>], iteration_bounds = array<i64: 1>, scalar_prefetch = 0 : i64, scratch_operands = 0 : i64, tpu.core_type = #tpu.core_type<tc>, window_params = [{transform_indices = @transform_0, window_bounds = array<i64: 16, 32>}, {pipeline_mode = #tpu.pipeline_mode<synchronous>, transform_indices = @transform_1, window_bounds = array<i64: 1, 32>}, {transform_indices = @transform_2, window_bounds = array<i64: 16, 32>}]} {
    %c0 = arith.constant 0 : index
    %c0_0 = arith.constant 0 : index
    %0 = vector.load %arg1[%c0, %c0_0] : memref<16x32xf32, #tpu.memory_space<vmem>>, vector<16x32xf32>
    %c0_1 = arith.constant 0 : index
    %c0_2 = arith.constant 0 : index
    %1 = vector.load %arg2[%c0_1, %c0_2] : memref<1x32xf32, #tpu.memory_space<vmem>>, vector<1x32xf32>
    %2 = arith.mulf %0, %0 : vector<16x32xf32>
    %cst = arith.constant dense<0.000000e+00> : vector<16xf32>
    %3 = vector.multi_reduction <add>, %2, %cst [1] : vector<16x32xf32> to vector<16xf32>
    %4 = vector.shape_cast %3 : vector<16xf32> to vector<16x1xf32>
    %cst_3 = arith.constant 3.125000e-02 : f32
    %5 = vector.broadcast %cst_3 : f32 to vector<16x1xf32>
    %6 = arith.mulf %4, %5 : vector<16x1xf32>
    %cst_4 = arith.constant 9.99999997E-7 : f32
    %7 = vector.broadcast %cst_4 : f32 to vector<16x1xf32>
    %8 = arith.addf %6, %7 : vector<16x1xf32>
    %9 = math.rsqrt %8 : vector<16x1xf32>
    %10 = vector.broadcast %9 : vector<16x1xf32> to vector<16x32xf32>
    %11 = arith.mulf %0, %10 : vector<16x32xf32>
    %12 = vector.broadcast %1 : vector<1x32xf32> to vector<16x32xf32>
    %13 = arith.mulf %12, %11 : vector<16x32xf32>
    %c0_5 = arith.constant 0 : index
    %c0_6 = arith.constant 0 : index
    %14 = vector.load %arg3[%c0_5, %c0_6] : memref<16x32xf32, #tpu.memory_space<vmem>>, vector<16x32xf32>
    tpu.vector_store %arg3[%c0_5, %c0_6], %13 {strides = array<i32>} : memref<16x32xf32, #tpu.memory_space<vmem>>, vector<16x32xf32>,
    return
  }
  func.func @transform_0(%arg0: i32) -> (i32, i32) {
    %c0_i32 = arith.constant 0 : i32
    %c0_i32_0 = arith.constant 0 : i32
    return %arg0, %c0_i32 : i32, i32
  }
  func.func @transform_1(%arg0: i32) -> (i32, i32) {
    %c0_i32 = arith.constant 0 : i32
    %c0_i32_0 = arith.constant 0 : i32
    %c0_i32_1 = arith.constant 0 : i32
    return %c0_i32, %c0_i32_0 : i32, i32
  }
  func.func @transform_2(%arg0: i32) -> (i32, i32) {
    %c0_i32 = arith.constant 0 : i32
    %c0_i32_0 = arith.constant 0 : i32
    return %arg0, %c0_i32 : i32, i32
  }
}

</mosaic_0001>

<bundles_post_ra>
// kernel: tpu_custom_call.1
= control target key start
LH: loop header
LB: loop body
LE: loop exit
PB: predicated region body
PF: predicated region fallthrough
CT: control target
= control target key end

     0   :  { %7 = vsyncpa [#allocation3], 0  ;;  %s186_s0 = inlined_call_operand.hbm [shape: f32[16,32], index: 0, kind: input, shape index: {}]   ;;  %s187_s1 = inlined_call_operand.vmem [shape: f32[1,32], index: 1, kind: input, shape index: {}]   ;;  %s188_s2 = inlined_call_operand.hbm [shape: f32[16,32], index: 2, kind: output, shape index: {}]  }
   0x1   :  { %8 = vsyncpa [#allocation4], 0  ;;  %s130_s9 = smov [#allocation2]   ;;  %s82_s13 = scalar_lea.hbm %s186_s0, 256 }
   0x2   :  { %s14_s10 = sshll.u32 %s130_s9, 4  ;;  %p83_p0 = scmp.ne.s32.totalorder %s186_s0, %s82_s13  ;;  %s15_s10 = int_to_ptr.vmem [resolvable:$true] %s14_s10 }
   0x3   :  { %p86_p1 = scmp.lt.u32.totalorder %s82_s13, %s186_s0 }
   0x5   :  { %p88_p2 = pnand %p86_p1, %p83_p0 }
   0x7   :  { %91 = shalt.err (!%p88_p2)
}
   0x8   :  { %s92_s18 = scalar_lea.vmem %s15_s10, 256  ;;  %p97_p4 = scmp.lt.s32.totalorder %s15_s10, %s15_s10 }
   0x9   :  { %p93_p3 = scmp.ne.s32.totalorder %s15_s10, %s92_s18  ;;  %p98_p5 = scmp.lt.s32.totalorder %s92_s18, %s92_s18 }
   0xb   :  { %p99_p6 = por %p98_p5, %p97_p4 }
   0xd   :  { %p100_p7 = pnand %p99_p6, %p93_p3 }
   0xf   :  { %103 = shalt.err (!%p100_p7)
}
  0x10   :  { %s131_s19 = smov 128   ;;  %s132_s20 = smov 8  }
  0x11   :  { %20 = dma.hbm_to_vmem [thread:$0]  %s186_s0, 256, %s15_s10, [#allocation3], %s131_s19, %s131_s19, %s132_s20  }
  0x12   :  { %126 = dma.done.wait [#allocation3], 256  }
  0x13   :  { %127 = vsyncadd [#allocation3], 4294967040  ;;  %v26_v0 = vld [vmem:[#allocation2] sm:$0xff]  ;;  %vm31_vm0 = vcmask 261120   ;;  %v27_v1 = vld [vmem:[#allocation2 + $0x8] sm:$0xff]  ;;  %s133_s24 = smov [#allocation5]  }
  0x14   :  { %v29_v2 = vmul.f32 %v26_v0, %v26_v0  ;;  %v30_v3 = vmul.f32 %v27_v1, %v27_v1  ;;  %v73_v13 = vld [vmem:[%s187_s1] ss:$0 sm:$0xff]  ;;  %s61_s25 = sshll.u32 %s133_s24, 4  ;;  %s62_s25 = int_to_ptr.vmem [resolvable:$true] %s61_s25 }
  0x15   :  { %s104_s26 = scalar_lea.vmem %s62_s25, 256  ;;  %p109_p9 = scmp.lt.s32.totalorder %s62_s25, %s62_s25 }
  0x16   :  { %v32_v4 = vsel %vm31_vm0, %v29_v2, 0.0  ;;  %v35_v5 = vsel %vm31_vm0, %v30_v3, 0.0  ;;  %p105_p8 = scmp.ne.s32.totalorder %s62_s25, %s104_s26  ;;  %p110_p10 = scmp.lt.s32.totalorder %s104_s26, %s104_s26 }
  0x17   :  { %33 = vadd.xlane.f32.xlu0 %v32_v4 }
  0x18   :  { %p111_p11 = por %p110_p10, %p109_p9 }
  0x1a   :  { %p112_p12 = pnand %p111_p11, %p105_p8 }
  0x1b   :  { %36 = vadd.xlane.f32.xlu0 %v35_v5 }
  0xa4   :  { %v34_v6 = vpop.xlane.xlu0 %33 }
  0xa5   :  { %v38_v7 = vmul.f32 0.03125, %v34_v6 }
  0xa7   :  { %v40_v8 = vadd.f32 1e-06, %v38_v7 }
  0xa8   :  { %v37_v9 = vpop.xlane.xlu0 %36 }
  0xa9   :  { %78 = vrsqrt.f32 %v40_v8  ;;  %v39_v10 = vmul.f32 0.03125, %v37_v9 }
  0xab   :  { %v41_v11 = vadd.f32 1e-06, %v39_v10 }
  0xad   :  { %80 = vrsqrt.f32 %v41_v11 }
  0xb3   :  { %v79_v12 = vpop.eup %78 }
  0xb4   :  { %v44_v14 = vmul.f32 %v79_v12, %v26_v0 }
  0xb6   :  { %v52_v15 = vmul.f32 %v73_v13, %v44_v14 }
  0xb7   :  { %v81_v16 = vpop.eup %80 }
  0xb8   :  { %v45_v17 = vmul.f32 %v81_v16, %v27_v1  ;;  %54 = vst.msk [vmem:[#allocation5] sm:$0xff] %vm31_vm0, %v52_v15 }
  0xba   :  { %v53_v18 = vmul.f32 %v73_v13, %v45_v17 }
  0xbc   :  { %55 = vst.msk [vmem:[#allocation5 + $0x8] sm:$0xff] %vm31_vm0, %v53_v18 }
  0xbd   :  { %115 = shalt.err (!%p112_p12)
}
  0xbe   :  { %s116_s28 = scalar_lea.hbm %s188_s2, 256 }
  0xbf   :  { %p117_p13 = scmp.ne.s32.totalorder %s188_s2, %s116_s28  ;;  %p120_p0 = scmp.lt.u32.totalorder %s116_s28, %s188_s2 }
  0xc1   :  { %p122_p1 = pnand %p120_p0, %p117_p13 }
  0xc3   :  { %125 = shalt.err (!%p122_p1)
}
  0xc4   :  { %67 = dma.vmem_to_hbm [thread:$0]  %s62_s25, 256, %s188_s2, [#allocation4], %s131_s19, %s131_s19, %s132_s20  }
  0xc5   :  { %128 = dma.done.wait [#allocation4], 256  }
  0xc6   :  { %129 = vsyncadd [#allocation4], 4294967040 }
  0xc7   :  { %71 = vsyncpa [#allocation3], 1 }
  0xc8   :  { %72 = vsyncpa [#allocation4], 1 }

</bundles_post_ra>
